<compile_context>
chip_gen: v6e
topology: v6e:2x2x1
jax: 0.10.0
libtpu: 0.0.40
codegen_flags: <defaults>
</compile_context>

<pallas_src>
import math

import jax
import jax.numpy as jnp
from jax.experimental import pallas as pl
from jax.experimental.pallas import tpu as pltpu


def to_2tuple(x):
    return (x, x) if isinstance(x, int) else tuple(x)


def _round_up(a, b):
    return (a + b - 1) // b * b


# ---------------------------------------------------------------------------
# Pallas kernel: M-tiled im2col GEMM + bias (the Conv2d compute)
# ---------------------------------------------------------------------------
def _conv_gemm_kernel(x_ref, w_ref, b_ref, o_ref):
    # x_ref: (TM, K) compute dtype, w_ref: (K, DP) compute dtype,
    # b_ref: (1, DP) f32, o_ref: (TM, DP) f32
    acc = jnp.dot(x_ref[...], w_ref[...], preferred_element_type=jnp.float32)
    o_ref[...] = (acc + b_ref[...]).astype(o_ref.dtype)


def _conv_gemm(x, w, b, *, tm):
    """x: (MP, K), w: (K, DP), b: (1, DP) f32.  MP % tm == 0, DP % 128 == 0."""
    MP, K = x.shape
    _, DP = w.shape
    assert MP % tm == 0 and DP % 128 == 0

    flops = 2 * MP * K * DP
    bytes_accessed = (x.size * x.dtype.itemsize
                      + w.size * w.dtype.itemsize
                      + b.size * 4
                      + MP * DP * 4)

    return pl.pallas_call(
        _conv_gemm_kernel,
        out_shape=jax.ShapeDtypeStruct((MP, DP), jnp.float32),
        grid=(MP // tm,),
        in_specs=[
            pl.BlockSpec((tm, K), lambda i: (i, 0)),    # X streams over M
            pl.BlockSpec((K, DP), lambda i: (0, 0)),    # W resident
            pl.BlockSpec((1, DP), lambda i: (0, 0)),    # bias resident
        ],
        out_specs=pl.BlockSpec((tm, DP), lambda i: (i, 0)),
        compiler_params=pltpu.CompilerParams(
            dimension_semantics=("parallel",)),
        cost_estimate=pl.CostEstimate(
            flops=flops, transcendentals=0, bytes_accessed=bytes_accessed),
    )(x, w, b)


# ---------------------------------------------------------------------------
# PatchEmbedding forward
# ---------------------------------------------------------------------------
def patch_embedding_forward(images, weight, bias, *, image_size, patch_size,
                            inner_dim, inner_stride,
                            compute_dtype=jnp.bfloat16, tm=4096):
    image_size = to_2tuple(image_size)
    patch_size = to_2tuple(patch_size)
    B, C, H, W = images.shape
    assert H == image_size[0] and W == image_size[1], (
        "Input Image and Expected size doesn't match")
    ph, pw = patch_size
    nph, npw = H // ph, W // pw
    num_patches = nph * npw
    s = inner_stride
    kh = kw = 7
    pad = 3
    oh = (ph + 2 * pad - kh) // s + 1
    ow = (pw + 2 * pad - kw) // s + 1
    num_words = oh * ow
    assert num_words == math.ceil(ph / s) * math.ceil(pw / s)

    # --- nn.Unfold(kernel=patch, stride=patch) + reshape (glue, no FLOPs) ---
    # -> (B*num_patches, C, ph, pw), patches in row-major spatial order
    patches = images.reshape(B, C, nph, ph, npw, pw)
    patches = patches.transpose(0, 2, 4, 1, 3, 5).reshape(
        B * num_patches, C, ph, pw)
    N = B * num_patches

    # --- im2col for Conv2d(3, inner_dim, k=7, pad=3, stride=s) ---
    # Built from 49 static strided slices (no XLA gather, no index arrays).
    padded = jnp.pad(patches, ((0, 0), (0, 0), (pad, pad), (pad, pad)))
    taps = []
    for i in range(kh):
        for j in range(kw):
            taps.append(jax.lax.slice(
                padded,
                (0, 0, i, j),
                (N, C, i + (oh - 1) * s + 1, j + (ow - 1) * s + 1),
                (1, 1, s, s)))                       # each: (N, C, oh, ow)
    cols = jnp.stack(taps, axis=-1)                  # (N, C, oh, ow, kh*kw)
    cols = cols.transpose(0, 2, 3, 1, 4)             # (N, oh, ow, C, kh*kw)
    cols = cols.reshape(N * num_words, C * kh * kw)  # (M, K), inner (c, kh, kw)

    K = C * kh * kw
    M = N * num_words
    D = inner_dim
    DP = _round_up(D, 128)                           # lane-dense output

    # weight: (inner_dim, C, 7, 7) -> (K, D), zero-padded to (K, DP)
    w2 = weight.reshape(D, K).T
    w2 = jnp.pad(w2, ((0, 0), (0, DP - D)))
    b2 = jnp.pad(bias.astype(jnp.float32).reshape(1, D), ((0, 0), (0, DP - D)))

    # Pad M up to a multiple of the tile (tile is a multiple of 16 for bf16).
    tm_eff = max(16, min(tm, _round_up(M, 16)))
    MP = _round_up(M, tm_eff)
    if MP > M:
        cols = jnp.pad(cols, ((0, MP - M), (0, 0)))

    # Stream X/W in the compute dtype (bf16 by default); accumulate in f32.
    cols = cols.astype(compute_dtype)
    w2 = w2.astype(compute_dtype)

    out = _conv_gemm(cols, w2, b2, tm=tm_eff)        # (MP, DP) f32
    out = out[:M, :D]                                # strip padding

    # rows are ordered (n, oh, ow)  ==  PyTorch's
    #   .reshape(N, inner_dim, -1).transpose(1, 2)
    return out.reshape(N, num_words, D)


# ---------------------------------------------------------------------------
# Reference (pure JAX, via lax conv) for sanity checking
# ---------------------------------------------------------------------------
def _reference(images, weight, bias, *, image_size, patch_size, inner_dim,
               inner_stride):
    patch_size = to_2tuple(patch_size)
    B, C, H, W = images.shape
    ph, pw = patch_size
    nph, npw = H // ph, W // pw
    num_patches = nph * npw
    patches = images.reshape(B, C, nph, ph, npw, pw)
    patches = patches.transpose(0, 2, 4, 1, 3, 5).reshape(
        B * num_patches, C, ph, pw)
    y = jax.lax.conv_general_dilated(
        patches, weight, window_strides=(inner_stride, inner_stride),
        padding=((3, 3), (3, 3)),
        dimension_numbers=("NCHW", "OIHW", "NCHW"))
    y = y + bias.reshape(1, inner_dim, 1, 1)
    N = B * num_patches
    return y.reshape(N, inner_dim, -1).transpose(0, 2, 1)


if __name__ == "__main__":
    # Small config consistent with the module:
    #   image_size=16, patch_size=8, inner_dim=32, inner_stride=4
    #   -> num_patches = 4, num_words = ceil(8/4)^2 = 4
    batch = 2
    image_size = 16
    patch_size = 8
    inner_dim = 32
    inner_stride = 4
    channels = 3  # Conv2d(3, inner_dim, ...) fixes input channels at 3

    key = jax.random.PRNGKey(0)
    k_x, k_w, k_b = jax.random.split(key, 3)
    x = jax.random.normal(k_x, (batch, channels, image_size, image_size),
                          dtype=jnp.float32)
    fan_in = channels * 7 * 7
    bound = 1.0 / math.sqrt(fan_in)
    weight = jax.random.uniform(k_w, (inner_dim, channels, 7, 7),
                                minval=-bound, maxval=bound,
                                dtype=jnp.float32)
    bias = jax.random.uniform(k_b, (inner_dim,), minval=-bound, maxval=bound,
                              dtype=jnp.float32)

    ref = _reference(
        x, weight, bias, image_size=image_size, patch_size=patch_size,
        inner_dim=inner_dim, inner_stride=inner_stride)
    ref = jax.block_until_ready(ref)
    expected_shape = (batch * 4, 4, inner_dim)  # (B*num_patches, num_words, D)

    # 1) f32 compute path: exact check of the kernel / im2col logic.
    out_f32 = patch_embedding_forward(
        x, weight, bias, image_size=image_size, patch_size=patch_size,
        inner_dim=inner_dim, inner_stride=inner_stride,
        compute_dtype=jnp.float32)
    out_f32 = jax.block_until_ready(out_f32)
    assert out_f32.shape == expected_shape, out_f32.shape
    assert jnp.allclose(out_f32, ref, atol=1e-4, rtol=1e-4)

    # 2) bf16 fast path (default): f32 accumulation, looser tolerance.
    out_bf16 = patch_embedding_forward(
        x, weight, bias, image_size=image_size, patch_size=patch_size,
        inner_dim=inner_dim, inner_stride=inner_stride)
    out_bf16 = jax.block_until_ready(out_bf16)
    assert out_bf16.shape == expected_shape, out_bf16.shape
    assert jnp.allclose(out_bf16, ref, atol=5e-2, rtol=5e-2)

    print("KERNEL_OK")
</pallas_src>

<mosaic_0001>
module attributes {stable_mosaic.version = 11 : i64} {
  func.func @_conv_gemm_kernel(%arg0: i32, %arg1: memref<32x147xf32, #tpu.memory_space<vmem>>, %arg2: memref<147x128xf32, #tpu.memory_space<vmem>>, %arg3: memref<1x128xf32, #tpu.memory_space<vmem>>, %arg4: memref<32x128xf32, #tpu.memory_space<vmem>>) attributes {dimension_semantics = [#tpu.dimension_semantics<parallel>], iteration_bounds = array<i64: 1>, scalar_prefetch = 0 : i64, scratch_operands = 0 : i64, tpu.core_type = #tpu.core_type<tc>, window_params = [{transform_indices = @transform_0, window_bounds = array<i64: 32, 147>}, {pipeline_mode = #tpu.pipeline_mode<synchronous>, transform_indices = @transform_1, window_bounds = array<i64: 147, 128>}, {pipeline_mode = #tpu.pipeline_mode<synchronous>, transform_indices = @transform_2, window_bounds = array<i64: 1, 128>}, {transform_indices = @transform_3, window_bounds = array<i64: 32, 128>}]} {
    %c0 = arith.constant 0 : index
    %c0_0 = arith.constant 0 : index
    %0 = vector.load %arg1[%c0, %c0_0] : memref<32x147xf32, #tpu.memory_space<vmem>>, vector<32x147xf32>
    %c0_1 = arith.constant 0 : index
    %c0_2 = arith.constant 0 : index
    %1 = vector.load %arg2[%c0_1, %c0_2] : memref<147x128xf32, #tpu.memory_space<vmem>>, vector<147x128xf32>
    %cst = arith.constant dense<0.000000e+00> : vector<32x128xf32>
    %2 = tpu.matmul %0, %1, %cst {dimension_numbers = #tpu.dot_dimension_numbers<[1], [0], [0], [1], [0, 0, 1, 1], [], []>} : vector<32x147xf32>, vector<147x128xf32>, vector<32x128xf32> -> vector<32x128xf32>
    %c0_3 = arith.constant 0 : index
    %c0_4 = arith.constant 0 : index
    %3 = vector.load %arg3[%c0_3, %c0_4] : memref<1x128xf32, #tpu.memory_space<vmem>>, vector<1x128xf32>
    %4 = vector.broadcast %3 : vector<1x128xf32> to vector<32x128xf32>
    %5 = arith.addf %2, %4 : vector<32x128xf32>
    %c0_5 = arith.constant 0 : index
    %c0_6 = arith.constant 0 : index
    %6 = vector.load %arg4[%c0_5, %c0_6] : memref<32x128xf32, #tpu.memory_space<vmem>>, vector<32x128xf32>
    tpu.vector_store %arg4[%c0_5, %c0_6], %5 {strides = array<i32>} : memref<32x128xf32, #tpu.memory_space<vmem>>, vector<32x128xf32>,
    return
  }
  func.func @transform_0(%arg0: i32) -> (i32, i32) {
    %c0_i32 = arith.constant 0 : i32
    %c0_i32_0 = arith.constant 0 : i32
    return %arg0, %c0_i32 : i32, i32
  }
  func.func @transform_1(%arg0: i32) -> (i32, i32) {
    %c0_i32 = arith.constant 0 : i32
    %c0_i32_0 = arith.constant 0 : i32
    %c0_i32_1 = arith.constant 0 : i32
    return %c0_i32, %c0_i32_0 : i32, i32
  }
  func.func @transform_2(%arg0: i32) -> (i32, i32) {
    %c0_i32 = arith.constant 0 : i32
    %c0_i32_0 = arith.constant 0 : i32
    %c0_i32_1 = arith.constant 0 : i32
    return %c0_i32, %c0_i32_0 : i32, i32
  }
  func.func @transform_3(%arg0: i32) -> (i32, i32) {
    %c0_i32 = arith.constant 0 : i32
    %c0_i32_0 = arith.constant 0 : i32
    return %arg0, %c0_i32 : i32, i32
  }
}

</mosaic_0001>

<bundles_post_ra>
// kernel: tpu_custom_call.1
= control target key start
LH: loop header
LB: loop body
LE: loop exit
PB: predicated region body
PF: predicated region fallthrough
CT: control target
= control target key end

     0   :  { %8 = vsyncpa [#allocation3], 0  ;;  %s403_s0 = inlined_call_operand.hbm [shape: f32[32,147], index: 0, kind: input, shape index: {}]   ;;  %s404_s1 = inlined_call_operand.hbm [shape: f32[147,128], index: 1, kind: input, shape index: {}]   ;;  %s405_s2 = inlined_call_operand.vmem [shape: f32[1,128], index: 2, kind: input, shape index: {}]   ;;  %s406_s3 = inlined_call_operand.hbm [shape: f32[32,128], index: 3, kind: output, shape index: {}]  }
   0x1   :  { %9 = vsyncpa [#allocation6], 0 }
   0x2   :  { %10 = vsyncpa [#allocation4], 0  ;;  %s319_s12 = smov [#allocation2]  }
   0x3   :  { %s16_s13 = sshll.u32 %s319_s12, 4  ;;  %s17_s13 = int_to_ptr.vmem [resolvable:$true] %s16_s13 }
   0x4   :  { %s261_s14 = scalar_lea.vmem %s17_s13, 1024  ;;  %p266_p1 = scmp.lt.s32.totalorder %s17_s13, %s17_s13 }
   0x5   :  { %p262_p0 = scmp.ne.s32.totalorder %s17_s13, %s261_s14  ;;  %p267_p2 = scmp.lt.s32.totalorder %s261_s14, %s261_s14 }
   0x7   :  { %p268_p3 = por %p267_p2, %p266_p1 }
   0x9   :  { %p269_p4 = pnand %p268_p3, %p262_p0 }
   0xb   :  { %272 = shalt.err (!%p269_p4)
}
   0xc   :  { %s320_s15 = smov 256   ;;  %s321_s16 = smov 16  }
   0xd   :  { %22 = dma.hbm_to_vmem [thread:$0]  %s403_s0, 1024, %s17_s13, [#allocation3], %s320_s15, %s320_s15, %s321_s16  }
   0xe   :  { %s322_s19 = smov [#allocation5]  }
   0xf   :  { %s28_s20 = sshll.u32 %s322_s19, 4  ;;  %s29_s20 = int_to_ptr.vmem [resolvable:$true] %s28_s20 }
  0x10   :  { %s281_s21 = scalar_lea.vmem %s29_s20, 2432  ;;  %p286_p6 = scmp.lt.s32.totalorder %s29_s20, %s29_s20 }
  0x11   :  { %p282_p5 = scmp.ne.s32.totalorder %s29_s20, %s281_s21  ;;  %p287_p7 = scmp.lt.s32.totalorder %s281_s21, %s281_s21 }
  0x13   :  { %p288_p8 = por %p287_p7, %p286_p6 }
  0x15   :  { %p289_p9 = pnand %p288_p8, %p282_p5 }
  0x17   :  { %292 = shalt.err (!%p289_p9)
}
  0x18   :  { %s323_s22 = smov 128   ;;  %s324_s23 = smov 8  }
  0x19   :  { %34 = dma.hbm_to_vmem [thread:$0]  %s404_s1, 2432, %s29_s20, [#allocation6], %s323_s22, %s323_s22, %s324_s23  }
  0x1a   :  { %313 = dma.done.wait [#allocation3], 1024  }
  0x1b   :  { %314 = vsyncadd [#allocation3], 4294966272 }
  0x1c   :  { %315 = dma.done.wait [#allocation6], 2432  }
  0x1d   :  { %316 = vsyncadd [#allocation6], 4294964864  ;;  %v325_v0 = vmov 0.0   ;;  %v66_v1 = vld [vmem:[#allocation5 + $0x78] sm:$0xff]  ;;  %v65_v2 = vld [vmem:[#allocation5 + $0x70] sm:$0xff]  ;;  %vm90_vm0 = vcmask 1042432  }
  0x1e   :  { %94 = vmatprep.subr.mxu0 %v325_v0  ;;  %207 = vmatprep.subr.mxu1 %v325_v0  ;;  %v64_v3 = vld [vmem:[#allocation5 + $0x68] sm:$0xff]  ;;  %v63_v4 = vld [vmem:[#allocation5 + $0x60] sm:$0xff]  ;;  %v62_v5 = vld [vmem:[#allocation5 + $0x58] sm:$0xff]  ;;  %vm77_vm1 = vcmask 154624   ;;  %s326_s26 = smov [#allocation7]  }
  0x1f   :  { %95 = vmatpush1.msra.mxu0 %v66_v1  ;;  %226 = vmatpush1.msra.mxu1 %v66_v1  ;;  %v61_v6 = vld [vmem:[#allocation5 + $0x50] sm:$0xff]  ;;  %v60_v7 = vld [vmem:[#allocation5 + $0x48] sm:$0xff]  ;;  %v59_v8 = vld [vmem:[#allocation5 + $0x40] sm:$0xff]  ;;  %s188_s27 = sshll.u32 %s326_s26, 4  ;;  %s189_s27 = int_to_ptr.vmem [resolvable:$true] %s188_s27 }
  0x20   :  { %96 = vmatprep.subr.mxu0 %v325_v0  ;;  %208 = vmatprep.subr.mxu1 %v325_v0  ;;  %v58_v9 = vld [vmem:[#allocation5 + $0x38] sm:$0xff]  ;;  %v57_v10 = vld [vmem:[#allocation5 + $0x30] sm:$0xff]  ;;  %v56_v11 = vld [vmem:[#allocation5 + $0x28] sm:$0xff]  ;;  %p298_p11 = scmp.lt.s32.totalorder %s189_s27, %s189_s27 }
  0x21   :  { %97 = vmatpush1.msra.mxu0 %v65_v2  ;;  %227 = vmatpush1.msra.mxu1 %v65_v2  ;;  %v55_v12 = vld [vmem:[#allocation5 + $0x20] sm:$0xff]  ;;  %v54_v13 = vld [vmem:[#allocation5 + $0x18] sm:$0xff]  ;;  %v53_v14 = vld [vmem:[#allocation5 + $0x10] sm:$0xff] }
  0x22   :  { %98 = vmatprep.subr.mxu0 %v325_v0  ;;  %209 = vmatprep.subr.mxu1 %v325_v0  ;;  %v52_v15 = vld [vmem:[#allocation5 + $0x8] sm:$0xff]  ;;  %v51_v16 = vld [vmem:[#allocation5] sm:$0xff]  ;;  %v69_v17 = vld [vmem:[#allocation5 + $0x90] sm:$0x7] }
  0x23   :  { %99 = vmatpush1.msra.mxu0 %v64_v3  ;;  %228 = vmatpush1.msra.mxu1 %v64_v3  ;;  %v68_v18 = vld [vmem:[#allocation5 + $0x88] sm:$0xff]  ;;  %v67_v19 = vld [vmem:[#allocation5 + $0x80] sm:$0xff]  ;;  %v46_v24 = vld [vmem:[#allocation2 + $0x18] sm:$0xff] }
  0x24   :  { %100 = vmatprep.subr.mxu0 %v325_v0  ;;  %210 = vmatprep.subr.mxu1 %v325_v0  ;;  %v44_v20 = vld [vmem:[#allocation2 + $0x8] sm:$0xff]  ;;  %v43_v22 = vld [vmem:[#allocation2] sm:$0xff]  ;;  %v50_v25 = vld [vmem:[#allocation2 + $0x38] sm:$0xff] }
  0x25   :  { %101 = vmatpush1.msra.mxu0 %v63_v4  ;;  %229 = vmatpush1.msra.mxu1 %v63_v4  ;;  %v48_v21 = vld [vmem:[#allocation2 + $0x28] sm:$0xff]  ;;  %v47_v23 = vld [vmem:[#allocation2 + $0x20] sm:$0xff]  ;;  %v45_v26 = vld [vmem:[#allocation2 + $0x10] sm:$0xff] }
  0x26   :  { %102 = vmatprep.subr.mxu0 %v325_v0  ;;  %211 = vmatprep.subr.mxu1 %v325_v0  ;;  %v49_v27 = vld [vmem:[#allocation2 + $0x30] sm:$0xff]  ;;  %v201_v28 = vld [vmem:[%s405_s2] ss:$0 sm:$0xff]  ;;  %s293_s2 = scalar_lea.vmem %s189_s27, 512 }
  0x27   :  { %103 = vmatpush1.msra.mxu0 %v62_v5  ;;  %230 = vmatpush1.msra.mxu1 %v62_v5  ;;  %p294_p10 = scmp.ne.s32.totalorder %s189_s27, %s293_s2  ;;  %p299_p12 = scmp.lt.s32.totalorder %s293_s2, %s293_s2 }
  0x28   :  { %104 = vmatprep.subr.mxu0 %v325_v0  ;;  %212 = vmatprep.subr.mxu1 %v325_v0 }
  0x29   :  { %105 = vmatpush1.msra.mxu0 %v61_v6  ;;  %231 = vmatpush1.msra.mxu1 %v61_v6  ;;  %p300_p13 = por %p299_p12, %p298_p11 }
  0x2a   :  { %106 = vmatprep.subr.mxu0 %v325_v0  ;;  %213 = vmatprep.subr.mxu1 %v325_v0 }
  0x2b   :  { %107 = vmatpush1.msra.mxu0 %v60_v7  ;;  %232 = vmatpush1.msra.mxu1 %v60_v7  ;;  %p301_p0 = pnand %p300_p13, %p294_p10 }
  0x2c   :  { %108 = vmatprep.subr.mxu0 %v325_v0  ;;  %214 = vmatprep.subr.mxu1 %v325_v0 }
  0x2d   :  { %109 = vmatpush1.msra.mxu0 %v59_v8  ;;  %233 = vmatpush1.msra.mxu1 %v59_v8 }
  0x2e   :  { %110 = vmatprep.subr.mxu0 %v325_v0  ;;  %215 = vmatprep.subr.mxu1 %v325_v0 }
  0x2f   :  { %111 = vmatpush1.msra.mxu0 %v58_v9  ;;  %234 = vmatpush1.msra.mxu1 %v58_v9 }
  0x30   :  { %112 = vmatprep.subr.mxu0 %v325_v0  ;;  %216 = vmatprep.subr.mxu1 %v325_v0 }
  0x31   :  { %113 = vmatpush1.msra.mxu0 %v57_v10  ;;  %235 = vmatpush1.msra.mxu1 %v57_v10 }
  0x32   :  { %114 = vmatprep.subr.mxu0 %v325_v0  ;;  %217 = vmatprep.subr.mxu1 %v325_v0 }
  0x33   :  { %115 = vmatpush1.msra.mxu0 %v56_v11  ;;  %236 = vmatpush1.msra.mxu1 %v56_v11 }
  0x34   :  { %116 = vmatprep.subr.mxu0 %v325_v0  ;;  %218 = vmatprep.subr.mxu1 %v325_v0 }
  0x35   :  { %117 = vmatpush1.msra.mxu0 %v55_v12  ;;  %237 = vmatpush1.msra.mxu1 %v55_v12 }
  0x36   :  { %118 = vmatprep.subr.mxu0 %v325_v0  ;;  %219 = vmatprep.subr.mxu1 %v325_v0 }
  0x37   :  { %119 = vmatpush1.msra.mxu0 %v54_v13  ;;  %238 = vmatpush1.msra.mxu1 %v54_v13 }
  0x38   :  { %120 = vmatprep.subr.mxu0 %v325_v0  ;;  %220 = vmatprep.subr.mxu1 %v325_v0 }
  0x39   :  { %121 = vmatpush1.msra.mxu0 %v53_v14  ;;  %239 = vmatpush1.msra.mxu1 %v53_v14 }
  0x3a   :  { %122 = vmatprep.subr.mxu0 %v325_v0  ;;  %221 = vmatprep.subr.mxu1 %v325_v0 }
  0x3b   :  { %123 = vmatpush1.msra.mxu0 %v52_v15  ;;  %240 = vmatpush1.msra.mxu1 %v52_v15 }
  0x3c   :  { %124 = vmatprep.subr.mxu0 %v325_v0  ;;  %222 = vmatprep.subr.mxu1 %v325_v0 }
  0x3d   :  { %125 = vmatpush1.msra.mxu0 %v51_v16  ;;  %241 = vmatpush1.msra.mxu1 %v51_v16 }
  0x3e   :  { %152 = vmatprep.subr.mxu0 %v325_v0  ;;  %223 = vmatprep.subr.mxu1 %v325_v0 }
  0x3f   :  { %202 = vmatpush2.msk.msra.mxu0 %vm90_vm0, %v69_v17  ;;  %242 = vmatpush2.msk.msra.mxu1 %vm90_vm0, %v69_v17 }
  0x40   :  { %154 = vmatprep.subr.mxu0 %v325_v0  ;;  %224 = vmatprep.subr.mxu1 %v325_v0 }
  0x41   :  { %155 = vmatpush2.msra.mxu0 %v68_v18  ;;  %243 = vmatpush2.msra.mxu1 %v68_v18 }
  0x42   :  { %156 = vmatprep.subr.mxu0 %v325_v0  ;;  %225 = vmatprep.subr.mxu1 %v325_v0 }
  0x43   :  { %157 = vmatpush2.msra.mxu0 %v67_v19  ;;  %244 = vmatpush2.msra.mxu1 %v67_v19 }
  0x44   :  { %203 = vmatprep.mubr.msk.f32.mxu0 %vm77_vm1, %v44_v20  ;;  %205 = vmatprep.mubr.msk.f32.mxu1 %vm77_vm1, %v48_v21 }
  0x45   :  { %159 = vmatmul.mubr.f32.vlgmr.msra.gmra.mxu0 %v43_v22  ;;  %169 = vmatmul.mubr.f32.vlgmr.msra.gmra.mxu1 %v47_v23 }
  0x46   :  { %204 = vmatprep.mubr.msk.f32.mxu0 %vm77_vm1, %v46_v24  ;;  %206 = vmatprep.mubr.msk.f32.mxu1 %vm77_vm1, %v50_v25 }
  0x49   :  { %164 = vmatmul.mubr.f32.gmra.mxu0 %v45_v26  ;;  %174 = vmatmul.mubr.f32.gmra.mxu1 %v49_v27 }
 0x105   :  { %v160_v29 = vpop.f32.mrf.mxu0  ;;  %v170_v30 = vpop.f32.mrf.mxu1 }
 0x106   :  { %v161_v31 = vadd.f32 %v201_v28, %v160_v29  ;;  %v171_v32 = vadd.f32 %v201_v28, %v170_v30 }
 0x107   :  { %v162_v33 = vpop.f32.mrf.mxu0  ;;  %v172_v34 = vpop.f32.mrf.mxu1 }
 0x108   :  { %179 = vst [vmem:[#allocation7] sm:$0xff] %v161_v31  ;;  %181 = vst [vmem:[#allocation7 + $0x10] sm:$0xff] %v171_v32 }
 0x109   :  { %v165_v35 = vpop.f32.mrf.mxu0  ;;  %v175_v36 = vpop.f32.mrf.mxu1 }
 0x10a   :  { %v166_v37 = vadd.f32 %v201_v28, %v165_v35  ;;  %v176_v38 = vadd.f32 %v201_v28, %v175_v36 }
 0x10b   :  { %v167_v39 = vpop.f32.mrf.mxu0  ;;  %v177_v40 = vpop.f32.mrf.mxu1 }
 0x10c   :  { %180 = vst [vmem:[#allocation7 + $0x8] sm:$0xff] %v166_v37  ;;  %182 = vst [vmem:[#allocation7 + $0x18] sm:$0xff] %v176_v38 }
 0x10d   :  { %304 = shalt.err (!%p301_p0)
}
 0x10e   :  { %194 = dma.vmem_to_hbm [thread:$0]  %s189_s27, 512, %s406_s3, [#allocation4], %s323_s22, %s323_s22, %s324_s23  }
 0x10f   :  { %317 = dma.done.wait [#allocation4], 512  }
 0x110   :  { %318 = vsyncadd [#allocation4], 4294966784 }
 0x111   :  { %198 = vsyncpa [#allocation3], 1 }
 0x112   :  { %199 = vsyncpa [#allocation6], 1 }
 0x113   :  { %200 = vsyncpa [#allocation4], 1 }

</bundles_post_ra>
